<compile_context>
chip_gen: v6e
topology: v6e:2x2x1
jax: 0.10.0
libtpu: 0.0.40
codegen_flags: <defaults>
</compile_context>

<pallas_src>
import functools

import jax
import jax.numpy as jnp
from jax.experimental import pallas as pl
from jax.experimental.pallas import tpu as pltpu


# ------------------------------------------------------------------------
# Pallas kernel: whole-array HBM→HBM copy via a few in-flight DMAs.
# ------------------------------------------------------------------------
def _dma_identity_kernel(x_hbm, o_hbm, sems, *, chunks):
    """Copy x_hbm -> o_hbm with one async DMA per (static) row-chunk.

    `chunks` is a static Python list of (row_start, row_count) covering the
    full leading axis.  All copies are started first, then waited on, so the
    DMA engines keep several transfers in flight with zero TensorCore work.
    """
    copies = []
    for c, (start, size) in enumerate(chunks):
        sl = pl.ds(start, size)  # static start/size -> free ref view
        copies.append(
            pltpu.make_async_copy(x_hbm.at[sl], o_hbm.at[sl], sems.at[c])
        )
    for cp in copies:
        cp.start()
    for cp in copies:
        cp.wait()


def _as_2d(x: jax.Array) -> jax.Array:
    """Reshape to a 2D (rows, cols) slab so we can chunk the DMA by rows.

    Identity is layout-agnostic, so this reshape is free plumbing.  For 0/1-D
    inputs we try to factor out a 128-aligned column width to get >1 row.
    """
    if x.ndim >= 2:
        return x.reshape(-1, x.shape[-1])
    n = max(1, x.size)
    for cols in (2048, 1024, 512, 256, 128):
        if n % cols == 0:
            return x.reshape(n // cols, cols)
    return x.reshape(1, n)


def identity_pallas(x: jax.Array) -> jax.Array:
    """Materialize a fresh buffer equal to `x` via a Pallas HBM→HBM DMA copy."""
    if x.size == 0:
        return x

    orig_shape = x.shape
    x2 = _as_2d(x)
    rows, _ = x2.shape

    # Chunk count: target >= ~1 MiB per in-flight DMA, at most 8 chunks, and
    # never more chunks than rows.  (itemsize is only used for sizing here,
    # so sub-byte dtypes merely get a slightly conservative chunk count.)
    total_bytes = x.size * x.dtype.itemsize
    num_chunks = int(max(1, min(8, total_bytes // (1 << 20), rows)))

    # Static (start, size) row ranges covering [0, rows); sizes may be uneven.
    base, rem = divmod(rows, num_chunks)
    chunks, start = [], 0
    for c in range(num_chunks):
        size = base + (1 if c < rem else 0)
        if size > 0:
            chunks.append((start, size))
        start += size

    out2 = pl.pallas_call(
        functools.partial(_dma_identity_kernel, chunks=chunks),
        out_shape=jax.ShapeDtypeStruct(x2.shape, x2.dtype),
        in_specs=[pl.BlockSpec(memory_space=pl.ANY)],   # raw HBM ref, no auto-DMA
        out_specs=pl.BlockSpec(memory_space=pl.ANY),    # written only via DMA
        scratch_shapes=[pltpu.SemaphoreType.DMA((len(chunks),))],
    )(x2)

    return out2.reshape(orig_shape)


def identity(x: jax.Array, materialize: bool = False) -> jax.Array:
    """Forward pass of nn.Identity: returns the input unchanged.

    The default path is a true no-op (returns `x` itself) — identical
    semantics to the PyTorch module and the fastest possible implementation.
    Set `materialize=True` to force a fresh buffer via the Pallas DMA kernel
    (e.g. when a physical copy is actually required).
    """
    if materialize:
        return identity_pallas(x)
    return x


class Identity:
    """Mirror of the PyTorch module: forward(input) -> input."""

    def __init__(self, *args, **kwargs):
        pass

    def __call__(self, x: jax.Array) -> jax.Array:
        return identity(x)


if __name__ == "__main__":
    key = jax.random.PRNGKey(0)
    x = jax.random.normal(key, (2, 4, 16, 16), dtype=jnp.float32)

    # Default forward: true no-op, exactly nn.Identity semantics.
    mod = Identity()
    y = jax.block_until_ready(mod(x))
    assert y.shape == x.shape and y.dtype == x.dtype
    assert bool(jnp.all(y == x))

    # Pallas DMA-copy path on the module's example shape (single-chunk DMA).
    y2 = jax.block_until_ready(identity_pallas(x))
    assert y2.shape == x.shape and y2.dtype == x.dtype
    assert bool(jnp.all(y2 == x))

    # Larger, non-(8,128)-aligned shape exercising the multi-chunk DMA path.
    xb = jax.random.normal(jax.random.PRNGKey(0), (8, 333, 517), dtype=jnp.float32)
    yb = jax.block_until_ready(identity_pallas(xb))
    assert yb.shape == xb.shape and yb.dtype == xb.dtype
    assert bool(jnp.all(yb == xb))

    print("KERNEL_OK")
</pallas_src>

<mosaic_0001>
module attributes {stable_mosaic.version = 11 : i64} {
  func.func @_dma_identity_kernel(%arg0: memref<128x16xf32, #tpu.memory_space<any>>, %arg1: memref<128x16xf32, #tpu.memory_space<any>>, %arg2: memref<1x!tpu.dma_semaphore, #tpu.memory_space<semaphore_mem>>) attributes {dimension_semantics = [], scalar_prefetch = 0 : i64, scratch_operands = 1 : i64, tpu.core_type = #tpu.core_type<tc>} {
    %c0_i32 = arith.constant 0 : i32
    %c0_i32_0 = arith.constant 0 : i32
    %c0_i32_1 = arith.constant 0 : i32
    %0 = tpu.memref_slice %arg0[%c0_i32_0, %c0_i32_1] : memref<128x16xf32, #tpu.memory_space<any>> -> memref<128x16xf32, #tpu.memory_space<any>>
    %c0_i32_2 = arith.constant 0 : i32
    %c0_i32_3 = arith.constant 0 : i32
    %1 = tpu.memref_slice %arg1[%c0_i32_2, %c0_i32_3] : memref<128x16xf32, #tpu.memory_space<any>> -> memref<128x16xf32, #tpu.memory_space<any>>
    %2 = tpu.memref_slice %arg2[%c0_i32] : memref<1x!tpu.dma_semaphore, #tpu.memory_space<semaphore_mem>> -> memref<1x!tpu.dma_semaphore, #tpu.memory_space<semaphore_mem>>
    %3 = tpu.memref_squeeze %2 : memref<1x!tpu.dma_semaphore, #tpu.memory_space<semaphore_mem>> -> memref<!tpu.dma_semaphore, #tpu.memory_space<semaphore_mem>>
    tpu.enqueue_dma source(%0 : memref<128x16xf32, #tpu.memory_space<any>>) target(%1 : memref<128x16xf32, #tpu.memory_space<any>>) target_semaphore(%3 : memref<!tpu.dma_semaphore, #tpu.memory_space<semaphore_mem>>)
    %c0_i32_4 = arith.constant 0 : i32
    %c0_i32_5 = arith.constant 0 : i32
    %c0_i32_6 = arith.constant 0 : i32
    %4 = tpu.memref_slice %arg0[%c0_i32_5, %c0_i32_6] : memref<128x16xf32, #tpu.memory_space<any>> -> memref<128x16xf32, #tpu.memory_space<any>>
    %c0_i32_7 = arith.constant 0 : i32
    %c0_i32_8 = arith.constant 0 : i32
    %5 = tpu.memref_slice %arg1[%c0_i32_7, %c0_i32_8] : memref<128x16xf32, #tpu.memory_space<any>> -> memref<128x16xf32, #tpu.memory_space<any>>
    %6 = tpu.memref_slice %arg2[%c0_i32_4] : memref<1x!tpu.dma_semaphore, #tpu.memory_space<semaphore_mem>> -> memref<1x!tpu.dma_semaphore, #tpu.memory_space<semaphore_mem>>
    %7 = tpu.memref_squeeze %6 : memref<1x!tpu.dma_semaphore, #tpu.memory_space<semaphore_mem>> -> memref<!tpu.dma_semaphore, #tpu.memory_space<semaphore_mem>>
    tpu.wait_dma2 semaphore(%7 : memref<!tpu.dma_semaphore, #tpu.memory_space<semaphore_mem>>) src(%4 : memref<128x16xf32, #tpu.memory_space<any>>) dst(%5 : memref<128x16xf32, #tpu.memory_space<any>>)
    return
  }
}

</mosaic_0001>

<bundles_post_ra>
// kernel: tpu_custom_call.1
= control target key start
LH: loop header
LB: loop body
LE: loop exit
PB: predicated region body
PF: predicated region fallthrough
CT: control target
= control target key end

     0   :  { %s205_s0 = inlined_call_operand.vmem [shape: f32[128,16], index: 0, kind: input, shape index: {}]   ;;  %s206_s1 = inlined_call_operand.vmem [shape: f32[128,16], index: 1, kind: output, shape index: {}]  }
   0x1   :  { %v39_v0 = vld [vmem:[%s205_s0] sm:$0xff]  ;;  %v41_v1 = vld [vmem:[%s205_s0 + $0x8] sm:$0xff]  ;;  %v43_v2 = vld [vmem:[%s205_s0 + $0x10] sm:$0xff] }
   0x2   :  { %40 = vst [vmem:[%s206_s1] sm:$0xff] %v39_v0  ;;  %42 = vst [vmem:[%s206_s1 + $0x8] sm:$0xff] %v41_v1  ;;  %v45_v3 = vld [vmem:[%s205_s0 + $0x18] sm:$0xff]  ;;  %v47_v4 = vld [vmem:[%s205_s0 + $0x20] sm:$0xff] }
   0x3   :  { %44 = vst [vmem:[%s206_s1 + $0x10] sm:$0xff] %v43_v2  ;;  %v49_v5 = vld [vmem:[%s205_s0 + $0x28] sm:$0xff]  ;;  %46 = vst [vmem:[%s206_s1 + $0x18] sm:$0xff] %v45_v3  ;;  %v51_v6 = vld [vmem:[%s205_s0 + $0x30] sm:$0xff] }
   0x4   :  { %48 = vst [vmem:[%s206_s1 + $0x20] sm:$0xff] %v47_v4  ;;  %50 = vst [vmem:[%s206_s1 + $0x28] sm:$0xff] %v49_v5  ;;  %v53_v7 = vld [vmem:[%s205_s0 + $0x38] sm:$0xff]  ;;  %v55_v8 = vld [vmem:[%s205_s0 + $0x40] sm:$0xff] }
   0x5   :  { %52 = vst [vmem:[%s206_s1 + $0x30] sm:$0xff] %v51_v6  ;;  %54 = vst [vmem:[%s206_s1 + $0x38] sm:$0xff] %v53_v7  ;;  %v57_v9 = vld [vmem:[%s205_s0 + $0x48] sm:$0xff]  ;;  %v59_v10 = vld [vmem:[%s205_s0 + $0x50] sm:$0xff] }
   0x6   :  { %56 = vst [vmem:[%s206_s1 + $0x40] sm:$0xff] %v55_v8  ;;  %v61_v11 = vld [vmem:[%s205_s0 + $0x58] sm:$0xff]  ;;  %58 = vst [vmem:[%s206_s1 + $0x48] sm:$0xff] %v57_v9  ;;  %v63_v12 = vld [vmem:[%s205_s0 + $0x60] sm:$0xff] }
   0x7   :  { %60 = vst [vmem:[%s206_s1 + $0x50] sm:$0xff] %v59_v10  ;;  %62 = vst [vmem:[%s206_s1 + $0x58] sm:$0xff] %v61_v11  ;;  %v65_v13 = vld [vmem:[%s205_s0 + $0x68] sm:$0xff]  ;;  %v67_v14 = vld [vmem:[%s205_s0 + $0x70] sm:$0xff] }
   0x8   :  { %64 = vst [vmem:[%s206_s1 + $0x60] sm:$0xff] %v63_v12  ;;  %66 = vst [vmem:[%s206_s1 + $0x68] sm:$0xff] %v65_v13  ;;  %v69_v15 = vld [vmem:[%s205_s0 + $0x78] sm:$0xff] }
   0x9   :  { %68 = vst [vmem:[%s206_s1 + $0x70] sm:$0xff] %v67_v14  ;;  %70 = vst [vmem:[%s206_s1 + $0x78] sm:$0xff] %v69_v15 }
   0xa   :  { %78 = vsyncadd [#allocation2], 2048 }
   0xb   :  { %97 = dma.done.wait [#allocation2], 2048 }
   0xc   :  { %98 = vsyncadd [#allocation2], 4294965248 }
   0xd   :  { %82 = vsyncmov [#allocation2] }
  0x10   :  { %s83_s12 = vpop.sfrf %82 }
  0x11   :  { %p96_p0 = scmp.ne.s32.totalorder %s83_s12, 0 }
  0x13   :  { %87 = shalt.err (%p96_p0)  }

</bundles_post_ra>
